<compile_context>
chip_gen: v7x
topology: tpu7x:2x2x1
jax: 0.10.0
libtpu: 0.0.40
codegen_flags: <defaults>
</compile_context>

<pallas_src>
import math

import jax
import jax.numpy as jnp
from jax.experimental import pallas as pl
from jax.experimental.pallas import tpu as pltpu

HIDDEN = 128   # fixed by the module definition
HEAD = 128     # lane-padded fused actor|critic output width (multiple of 128)


def _round_up(x, m):
    return ((x + m - 1) // m) * m


def _actor_critic_kernel(x_ref, w1_ref, b1_ref, w2_ref, b2_ref,
                         wh_ref, bh_ref, out_ref):
    # x_ref: [Bt, c] f32 batch tile; weights bf16, biases f32; out bf16.
    x = x_ref[...].astype(jnp.bfloat16)          # in-kernel cast (free VPU filler)

    # feature MLP: bf16 operands on the MXU, f32 accumulation, f32 VPU epilogue.
    h1 = jnp.dot(x, w1_ref[...], preferred_element_type=jnp.float32) + b1_ref[...]
    h1 = jnp.maximum(h1, 0.0)
    h2 = jnp.dot(h1.astype(jnp.bfloat16), w2_ref[...],
                 preferred_element_type=jnp.float32) + b2_ref[...]
    h2 = jnp.maximum(h2, 0.0)

    # fused actor|critic head -> single lane-dense [Bt, 128] bf16 store.
    out_ref[...] = (jnp.dot(h2.astype(jnp.bfloat16), wh_ref[...],
                            preferred_element_type=jnp.float32)
                    + bh_ref[...]).astype(out_ref.dtype)


def _choose_tile(batch, block_batch):
    """16-aligned batch tile + padded batch, guaranteeing >= 2 grid steps."""
    b16 = _round_up(max(batch, 1), 16)
    cap = _round_up(block_batch, 16)
    if b16 <= 2 * cap:
        # Whole batch fits in <= 2 tiles: split into exactly 2 grid steps so the
        # parallel axis can shard across v7x's two TensorCores.
        bt = max(16, _round_up(-(-b16 // 2), 16))
        return bt, 2 * bt
    bt = cap
    return bt, _round_up(b16, bt)


def actor_critic_forward(state, params, out_size, *, block_batch=8192):
    """state: [B, c] f32. Returns (policy [B, out_size], value [B, 1]) in f32."""
    B, c = state.shape
    if out_size + 1 > HEAD:
        raise ValueError(f"out_size + 1 must be <= {HEAD}, got {out_size}")

    bt, b_pad = _choose_tile(B, block_batch)

    x = state
    if b_pad != B:
        x = jnp.pad(x, ((0, b_pad - B), (0, 0)))   # padded rows compute throwaways

    w1, b1 = params["w1"], params["b1"]
    w2, b2 = params["w2"], params["b2"]
    wh, bh = params["wh"], params["bh"]

    flops = 2 * b_pad * (c * HIDDEN + HIDDEN * HIDDEN + HIDDEN * HEAD)
    bytes_accessed = (x.size * 4
                      + (w1.size + w2.size + wh.size) * 2
                      + (b1.size + b2.size + bh.size) * 4
                      + b_pad * HEAD * 2)

    const = lambda i: (0, 0)   # weights/biases: same block every grid step
    fused = pl.pallas_call(
        _actor_critic_kernel,
        out_shape=jax.ShapeDtypeStruct((b_pad, HEAD), jnp.bfloat16),
        grid=(b_pad // bt,),
        in_specs=[
            pl.BlockSpec((bt, c), lambda i: (i, 0)),        # streamed batch tile
            pl.BlockSpec((c, HIDDEN), const),
            pl.BlockSpec((1, HIDDEN), const),
            pl.BlockSpec((HIDDEN, HIDDEN), const),
            pl.BlockSpec((1, HIDDEN), const),
            pl.BlockSpec((HIDDEN, HEAD), const),
            pl.BlockSpec((1, HEAD), const),
        ],
        out_specs=pl.BlockSpec((bt, HEAD), lambda i: (i, 0)),
        compiler_params=pltpu.CompilerParams(
            dimension_semantics=("parallel",)),
        cost_estimate=pl.CostEstimate(flops=int(flops), transcendentals=0,
                                      bytes_accessed=int(bytes_accessed)),
    )(x, w1, b1, w2, b2, wh, bh)

    policy = fused[:B, :out_size].astype(jnp.float32)
    value = fused[:B, out_size:out_size + 1].astype(jnp.float32)
    return policy, value


def init_params(key, c, out_size):
    """kaiming_uniform_(a=1.0) on PyTorch's [out,in] == U(-sqrt(3/fan_in), +) on [in,out]."""
    ks = jax.random.split(key, 4)

    def kaiming(k, fan_in, fan_out):
        bound = math.sqrt(3.0 / fan_in)   # sqrt(6 / ((1 + a^2) * fan_in)), a = 1
        return jax.random.uniform(k, (fan_in, fan_out), jnp.float32, -bound, bound)

    w1 = kaiming(ks[0], c, HIDDEN)
    w2 = kaiming(ks[1], HIDDEN, HIDDEN)
    wa = kaiming(ks[2], HIDDEN, out_size)
    wc = kaiming(ks[3], HIDDEN, 1)

    # Fuse actor|critic into one lane-dense head, zero-padded to HEAD lanes.
    wh = jnp.zeros((HIDDEN, HEAD), jnp.float32)
    wh = wh.at[:, :out_size].set(wa).at[:, out_size:out_size + 1].set(wc)

    return {
        "w1": w1.astype(jnp.bfloat16),
        "b1": jnp.zeros((1, HIDDEN), jnp.float32),   # module zeroes all Linear biases
        "w2": w2.astype(jnp.bfloat16),
        "b2": jnp.zeros((1, HIDDEN), jnp.float32),
        "wh": wh.astype(jnp.bfloat16),
        "bh": jnp.zeros((1, HEAD), jnp.float32),
    }


def reference_forward(state, p, out_size):
    """Pure-JAX reference with identical bf16-operand / f32-accumulate / bf16-store semantics."""
    x = state.astype(jnp.bfloat16)
    h = jnp.maximum(jnp.dot(x, p["w1"], preferred_element_type=jnp.float32) + p["b1"], 0.0)
    h = jnp.maximum(jnp.dot(h.astype(jnp.bfloat16), p["w2"],
                            preferred_element_type=jnp.float32) + p["b2"], 0.0)
    out = jnp.dot(h.astype(jnp.bfloat16), p["wh"],
                  preferred_element_type=jnp.float32) + p["bh"]
    out = out.astype(jnp.bfloat16).astype(jnp.float32)
    return out[:, :out_size], out[:, out_size:out_size + 1]


if __name__ == "__main__":
    key = jax.random.PRNGKey(0)
    k_x, k_p = jax.random.split(key)

    # input_size would be (c, 84, 84); forward only consumes the channel dim.
    batch, c, out_size = 6, 4, 6          # batch=6 exercises the padded-tail path
    state = jax.random.normal(k_x, (batch, c), jnp.float32)
    params = init_params(k_p, c, out_size)

    policy, value = actor_critic_forward(state, params, out_size)
    jax.block_until_ready((policy, value))

    pol_ref, val_ref = reference_forward(state, params, out_size)
    assert policy.shape == (batch, out_size) and value.shape == (batch, 1)
    assert jnp.allclose(policy, pol_ref, atol=2e-2, rtol=2e-2)
    assert jnp.allclose(value, val_ref, atol=2e-2, rtol=2e-2)

    print("KERNEL_OK")
</pallas_src>

<mosaic_0001>
module attributes {stable_mosaic.version = 11 : i64} {
  func.func @_actor_critic_kernel(%arg0: i32, %arg1: memref<16x4xf32, #tpu.memory_space<vmem>>, %arg2: memref<4x128xbf16, #tpu.memory_space<vmem>>, %arg3: memref<1x128xf32, #tpu.memory_space<vmem>>, %arg4: memref<128x128xbf16, #tpu.memory_space<vmem>>, %arg5: memref<1x128xf32, #tpu.memory_space<vmem>>, %arg6: memref<128x128xbf16, #tpu.memory_space<vmem>>, %arg7: memref<1x128xf32, #tpu.memory_space<vmem>>, %arg8: memref<16x128xbf16, #tpu.memory_space<vmem>>) attributes {dimension_semantics = [#tpu.dimension_semantics<parallel>], iteration_bounds = array<i64: 2>, scalar_prefetch = 0 : i64, scratch_operands = 0 : i64, tpu.core_type = #tpu.core_type<tc>, window_params = [{transform_indices = @transform_0, window_bounds = array<i64: 16, 4>}, {pipeline_mode = #tpu.pipeline_mode<synchronous>, transform_indices = @transform_1, window_bounds = array<i64: 4, 128>}, {pipeline_mode = #tpu.pipeline_mode<synchronous>, transform_indices = @transform_2, window_bounds = array<i64: 1, 128>}, {pipeline_mode = #tpu.pipeline_mode<synchronous>, transform_indices = @transform_3, window_bounds = array<i64: 128, 128>}, {pipeline_mode = #tpu.pipeline_mode<synchronous>, transform_indices = @transform_4, window_bounds = array<i64: 1, 128>}, {pipeline_mode = #tpu.pipeline_mode<synchronous>, transform_indices = @transform_5, window_bounds = array<i64: 128, 128>}, {pipeline_mode = #tpu.pipeline_mode<synchronous>, transform_indices = @transform_6, window_bounds = array<i64: 1, 128>}, {transform_indices = @transform_7, window_bounds = array<i64: 16, 128>}]} {
    %c0 = arith.constant 0 : index
    %c0_0 = arith.constant 0 : index
    %0 = vector.load %arg1[%c0, %c0_0] : memref<16x4xf32, #tpu.memory_space<vmem>>, vector<16x4xf32>
    %1 = arith.truncf %0 : vector<16x4xf32> to vector<16x4xbf16>
    %c0_1 = arith.constant 0 : index
    %c0_2 = arith.constant 0 : index
    %2 = vector.load %arg2[%c0_1, %c0_2] : memref<4x128xbf16, #tpu.memory_space<vmem>>, vector<4x128xbf16>
    %cst = arith.constant dense<0.000000e+00> : vector<16x128xf32>
    %3 = tpu.matmul %1, %2, %cst {dimension_numbers = #tpu.dot_dimension_numbers<[1], [0], [0], [1], [0, 0, 1, 1], [], []>} : vector<16x4xbf16>, vector<4x128xbf16>, vector<16x128xf32> -> vector<16x128xf32>
    %c0_3 = arith.constant 0 : index
    %c0_4 = arith.constant 0 : index
    %4 = vector.load %arg3[%c0_3, %c0_4] : memref<1x128xf32, #tpu.memory_space<vmem>>, vector<1x128xf32>
    %5 = vector.broadcast %4 : vector<1x128xf32> to vector<16x128xf32>
    %6 = arith.addf %3, %5 : vector<16x128xf32>
    %cst_5 = arith.constant 0.000000e+00 : f32
    %7 = vector.broadcast %cst_5 : f32 to vector<16x128xf32>
    %8 = arith.maximumf %6, %7 : vector<16x128xf32>
    %9 = arith.truncf %8 : vector<16x128xf32> to vector<16x128xbf16>
    %c0_6 = arith.constant 0 : index
    %c0_7 = arith.constant 0 : index
    %10 = vector.load %arg4[%c0_6, %c0_7] : memref<128x128xbf16, #tpu.memory_space<vmem>>, vector<128x128xbf16>
    %cst_8 = arith.constant dense<0.000000e+00> : vector<16x128xf32>
    %11 = tpu.matmul %9, %10, %cst_8 {dimension_numbers = #tpu.dot_dimension_numbers<[1], [0], [0], [1], [0, 0, 1, 1], [], []>} : vector<16x128xbf16>, vector<128x128xbf16>, vector<16x128xf32> -> vector<16x128xf32>
    %c0_9 = arith.constant 0 : index
    %c0_10 = arith.constant 0 : index
    %12 = vector.load %arg5[%c0_9, %c0_10] : memref<1x128xf32, #tpu.memory_space<vmem>>, vector<1x128xf32>
    %13 = vector.broadcast %12 : vector<1x128xf32> to vector<16x128xf32>
    %14 = arith.addf %11, %13 : vector<16x128xf32>
    %cst_11 = arith.constant 0.000000e+00 : f32
    %15 = vector.broadcast %cst_11 : f32 to vector<16x128xf32>
    %16 = arith.maximumf %14, %15 : vector<16x128xf32>
    %17 = arith.truncf %16 : vector<16x128xf32> to vector<16x128xbf16>
    %c0_12 = arith.constant 0 : index
    %c0_13 = arith.constant 0 : index
    %18 = vector.load %arg6[%c0_12, %c0_13] : memref<128x128xbf16, #tpu.memory_space<vmem>>, vector<128x128xbf16>
    %cst_14 = arith.constant dense<0.000000e+00> : vector<16x128xf32>
    %19 = tpu.matmul %17, %18, %cst_14 {dimension_numbers = #tpu.dot_dimension_numbers<[1], [0], [0], [1], [0, 0, 1, 1], [], []>} : vector<16x128xbf16>, vector<128x128xbf16>, vector<16x128xf32> -> vector<16x128xf32>
    %c0_15 = arith.constant 0 : index
    %c0_16 = arith.constant 0 : index
    %20 = vector.load %arg7[%c0_15, %c0_16] : memref<1x128xf32, #tpu.memory_space<vmem>>, vector<1x128xf32>
    %21 = vector.broadcast %20 : vector<1x128xf32> to vector<16x128xf32>
    %22 = arith.addf %19, %21 : vector<16x128xf32>
    %23 = arith.truncf %22 : vector<16x128xf32> to vector<16x128xbf16>
    %c0_17 = arith.constant 0 : index
    %c0_18 = arith.constant 0 : index
    %24 = vector.load %arg8[%c0_17, %c0_18] : memref<16x128xbf16, #tpu.memory_space<vmem>>, vector<16x128xbf16>
    tpu.vector_store %arg8[%c0_17, %c0_18], %23 {strides = array<i32>} : memref<16x128xbf16, #tpu.memory_space<vmem>>, vector<16x128xbf16>,
    return
  }
  func.func @transform_0(%arg0: i32) -> (i32, i32) {
    %c0_i32 = arith.constant 0 : i32
    %c0_i32_0 = arith.constant 0 : i32
    return %arg0, %c0_i32 : i32, i32
  }
  func.func @transform_1(%arg0: i32) -> (i32, i32) {
    %c0_i32 = arith.constant 0 : i32
    %c0_i32_0 = arith.constant 0 : i32
    %c0_i32_1 = arith.constant 0 : i32
    return %c0_i32, %c0_i32_0 : i32, i32
  }
  func.func @transform_2(%arg0: i32) -> (i32, i32) {
    %c0_i32 = arith.constant 0 : i32
    %c0_i32_0 = arith.constant 0 : i32
    %c0_i32_1 = arith.constant 0 : i32
    return %c0_i32, %c0_i32_0 : i32, i32
  }
  func.func @transform_3(%arg0: i32) -> (i32, i32) {
    %c0_i32 = arith.constant 0 : i32
    %c0_i32_0 = arith.constant 0 : i32
    %c0_i32_1 = arith.constant 0 : i32
    return %c0_i32, %c0_i32_0 : i32, i32
  }
  func.func @transform_4(%arg0: i32) -> (i32, i32) {
    %c0_i32 = arith.constant 0 : i32
    %c0_i32_0 = arith.constant 0 : i32
    %c0_i32_1 = arith.constant 0 : i32
    return %c0_i32, %c0_i32_0 : i32, i32
  }
  func.func @transform_5(%arg0: i32) -> (i32, i32) {
    %c0_i32 = arith.constant 0 : i32
    %c0_i32_0 = arith.constant 0 : i32
    %c0_i32_1 = arith.constant 0 : i32
    return %c0_i32, %c0_i32_0 : i32, i32
  }
  func.func @transform_6(%arg0: i32) -> (i32, i32) {
    %c0_i32 = arith.constant 0 : i32
    %c0_i32_0 = arith.constant 0 : i32
    %c0_i32_1 = arith.constant 0 : i32
    return %c0_i32, %c0_i32_0 : i32, i32
  }
  func.func @transform_7(%arg0: i32) -> (i32, i32) {
    %c0_i32 = arith.constant 0 : i32
    %c0_i32_0 = arith.constant 0 : i32
    return %arg0, %c0_i32 : i32, i32
  }
}

</mosaic_0001>

<bundles_post_ra>
// kernel: tpu_custom_call.1
= control target key start
LH: loop header
LB: loop body
LE: loop exit
PB: predicated region body
PF: predicated region fallthrough
CT: control target
= control target key end

     0   :  { %12 = vsyncpa [#allocation3], 0  ;;  %s1289_s0 = inlined_call_operand.vmem [shape: f32[32,4], index: 0, kind: input, shape index: {}]   ;;  %s1290_s1 = inlined_call_operand.vmem [shape: bf16[4,128], index: 1, kind: input, shape index: {}]   ;;  %s1291_s2 = inlined_call_operand.vmem [shape: f32[1,128], index: 2, kind: input, shape index: {}]   ;;  %s1292_s3 = inlined_call_operand.hbm [shape: bf16[128,128], index: 3, kind: input, shape index: {}]   ;;  %s1293_s4 = inlined_call_operand.vmem [shape: f32[1,128], index: 4, kind: input, shape index: {}]   ;;  %s1294_s5 = inlined_call_operand.hbm [shape: bf16[128,128], index: 5, kind: input, shape index: {}]   ;;  %s1295_s6 = inlined_call_operand.vmem [shape: f32[1,128], index: 6, kind: input, shape index: {}]   ;;  %s1296_s7 = inlined_call_operand.hbm [shape: bf16[32,128], index: 7, kind: output, shape index: {}]  }
   0x1   :  { %13 = vsyncpa [#allocation6], 0 }
   0x2   :  { %14 = vsyncpa [#allocation4], 0 }
   0x3   :  { %16 = vsyncpa [#allocation4 + $0x1], 0  ;;  %s1080_s24 = smov 0   ;;  %s1082_s25 = smov 0  }
   0x4   :  { %s1084_s26 = smov 0   ;;  %s1086_s27 = smov 0  }
   0x5 LB: > { %s1101_s28 = sadd.s32 4294967295, %s1029_s27   ;;  %s709_s29 = sadd.s32 4294967294, %s1029_s27   ;;  %s1029_s27 = sphi %s1086_s27, %s1316_s27   ;;  %s1025_s26 = sphi %s1084_s26, %s1315_s26   ;;  %s1021_s25 = sphi %s1082_s25, %s1314_s25   ;;  %s1017_s24 = sphi %s1080_s24, %s1313_s24  }
   0x6   : > { %s1105_s30 = sadd.s32 1, %s1029_s27   ;;  %s181_s8 = sadd.s32 1, %s1025_s26 }
   0x7   : > { %s178_s9 = ssub.s32 %s1029_s27, %s1105_s30  ;;  %p191_p0 = scmp.ne.s32.totalorder %s1025_s26, %s1021_s25 }
   0x8   : > { %p179_p1 = scmp.eq.s32.totalorder %s178_s9, 0  ;;  %p192_p2 = scmp.eq.s32.totalorder %s1101_s28, 1 }
   0x9   : > { %p197_p3 = scmp.ne.s32.totalorder %s1021_s25, %s1017_s24  ;;  %p198_p4 = scmp.eq.s32.totalorder %s709_s29, 1 }
   0xa   : > { %s1116_s10 = scalar_select %p179_p1, %s1025_s26, %s181_s8  }
   0xb   : > { %p1118_p5 = por %p192_p2, %p191_p0  ;;  %p1122_p6 = por %p198_p4, %p197_p3 }
   0xc   : > { %1300 = sst [smem:[#allocation11_spill]] %s1116_s10  ;;  %p710_p7 = scmp.ge.s32.totalorder %s1029_s27, 1 }
   0xd   : > { %s1301_s11 = scalar_select %p1118_p5, 1, 0 }
   0xe   : > { %s1302_s12 = scalar_select %p1122_p6, 1, 0 }
   0xf   : > { %p205_p8 = scmp.lt.s32.totalorder %s1029_s27, 3  ;;  %p1297_p9 = scmp.eq.s32.totalorder %s1101_s28, 0 }
  0x10   : > { %s1031_s14 = smov [#allocation2]   ;;  %s1032_s17 = smov [#allocation5]  }
  0x11   : > { %p1129_p10 = pnand %p710_p7, %p205_p8  ;;  %s223_s15 = sshll.u32 %s1031_s14, 4  ;;  %s224_s15 = int_to_ptr.vmem [resolvable:$true] %s223_s15 }
  0x12   : > { %s239_s18 = sshll.u32 %s1032_s17, 4  ;;  %s903_s21 = scalar_lea.hbm %s1292_s3, 1024  ;;  %s1141_s18 = int_to_ptr.vmem [resolvable:$true] %s239_s18 }
  0x13   : > { %s1303_s13 = scalar_select %p1129_p10, 1, 0 }
  0x14   : > { %p831_p11 = pneg %p1129_p10  ;;  %p904_p13 = scmp.ne.s32.totalorder %s1292_s3, %s903_s21 }
  0x15   : > { %p910_p3 = scmp.lt.u32.totalorder %s903_s21, %s1292_s3 }
  0x16   : > { %p1137_p12 = pnand %p1297_p9, %p831_p11 }
  0x18   : > { %p905_p0 = pneg %p1137_p12 }
  0x1a   : > { %p906_p1 = pnand %p905_p0, %p904_p13 }
  0x1c   : > { %p907_p2 = pneg %p906_p1 }
  0x1e   : > { %p912_p4 = pnand %p910_p3, %p907_p2 }
  0x20   : > { %915 = shalt.err (!%p912_p4)
}
  0x21   : > { %s916_s9 = scalar_lea.vmem %s224_s15, 1024  ;;  %p924_p9 = scmp.lt.s32.totalorder %s224_s15, %s224_s15 }
  0x22   : > { %p917_p7 = scmp.ne.s32.totalorder %s224_s15, %s916_s9  ;;  %p925_p6 = scmp.lt.s32.totalorder %s916_s9, %s916_s9 }
  0x24   : > { %p919_p8 = pnand %p917_p7, %p905_p0  ;;  %p926_p5 = por %p925_p6, %p924_p9 }
  0x26   : > { %p920_p11 = pneg %p919_p8 }
  0x28   : > { %p927_p10 = pnand %p926_p5, %p920_p11 }
  0x2a   : > { %930 = shalt.err (!%p927_p10)
}
  0x2b   : > { %s1033_s14 = smov 64   ;;  %s1034_s17 = smov 4  }
  0x2c   : > { %834 = dma.hbm_to_vmem [thread:$0]  (!%p1137_p12), %s1292_s3, 1024, %s224_s15, [#allocation3], %s1033_s14, %s1033_s14, %s1034_s17  }
  0x2d   : > { %s931_s23 = scalar_lea.hbm %s1294_s5, 1024 }
  0x2e   : > { %p932_p13 = scmp.ne.s32.totalorder %s1294_s5, %s931_s23  ;;  %p938_p9 = scmp.lt.u32.totalorder %s931_s23, %s1294_s5 }
  0x30   : > { %p934_p5 = pnand %p932_p13, %p905_p0 }
  0x32   : > { %p935_p6 = pneg %p934_p5 }
  0x34   : > { %p940_p10 = pnand %p938_p9, %p935_p6 }
  0x36   : > { %943 = shalt.err (!%p940_p10)
}
  0x37   : > { %s944_s15 = scalar_lea.vmem %s1141_s18, 1024  ;;  %p952_p4 = scmp.lt.s32.totalorder %s1141_s18, %s1141_s18 }
  0x38   : > { %p945_p1 = scmp.ne.s32.totalorder %s1141_s18, %s944_s15  ;;  %p953_p7 = scmp.lt.s32.totalorder %s944_s15, %s944_s15 }
  0x3a   : > { %p947_p2 = pnand %p945_p1, %p905_p0  ;;  %p954_p8 = por %p953_p7, %p952_p4 }
  0x3c   : > { %p948_p3 = pneg %p947_p2 }
  0x3e   : > { %p955_p11 = pnand %p954_p8, %p948_p3 }
  0x40   : > { %958 = shalt.err (!%p955_p11)
}
  0x41   : > { %837 = dma.hbm_to_vmem [thread:$0]  (!%p1137_p12), %s1294_s5, 1024, %s1141_s18, [#allocation6], %s1033_s14, %s1033_s14, %s1034_s17  }
  0x42   : > { %p1305_p13 = scmp.ne.s32.totalorder %s1303_s13, 0 }
  0x43   : > { %p1306_p5 = scmp.eq.s32.totalorder (!%p1305_p13), %s1101_s28, 0 }
  0x44   : > { %267 = sbr.rel (%p1305_p13) target bundleno = 762 (0x2fa), region = 48 }
  0x4b   : > { %1004 = dma.done.wait (%p1306_p5), [#allocation3], 1024   ;;  %p1307_p0 = pmov %p1306_p5 }
  0x4d   : > { %1006 = vsyncadd (%p1307_p0), [#allocation3], 4294966272  ;;  %p1308_p6 = pmov %p1307_p0 }
  0x4e   : > { %p1309_p9 = pmov %p1307_p0 }
  0x4f   : > { %1008 = dma.done.wait (%p1308_p6), [#allocation6], 1024  }
  0x50   : > { %1010 = vsyncadd (%p1309_p9), [#allocation6], 4294966272  ;;  %s718_s16 = sshll.u32 %s1101_s28, 1  ;;  %v1035_v0 = vmov 0.0   ;;  %vm1036_vm0 = vmmov 0   ;;  %vm326_vm1 = vcmask 1041408  }
  0x51   : > { %775 = vmatprep.subr.bf16.mxu0 %v1035_v0  ;;  %777 = vmatprep.mubr.msk.bf16.mxu0 %vm1036_vm0, %v1035_v0  ;;  %p304_p12 = scmp.lt.s32.totalorder %s718_s16, 3  ;;  %v314_v1 = vld [vmem:[%s1290_s1] sm:$0x3]  ;;  %vm322_vm2 = vcmask 31744   ;;  %v888_v7 = vld [vmem:[#allocation2 + $0x8] sm:$0xff]   ;;  %v889_v8 = vld [vmem:[#allocation2 + $0x10] sm:$0xff]  }
  0x52   : > { %781 = vmatprep.subr.bf16.mxu1 %v1035_v0  ;;  %797 = vmatprep.mubr.msk.bf16.mxu1 %vm1036_vm0, %v1035_v0  ;;  %v328_v4 = vsel %vm326_vm1, %v314_v1, 0  ;;  %v887_v6 = vld [vmem:[#allocation2] sm:$0xff]   ;;  %v890_v9 = vld [vmem:[#allocation2 + $0x18] sm:$0xff]   ;;  %v892_v11 = vld [vmem:[#allocation2 + $0x28] sm:$0xff]   ;;  %s300_s9 = sand.u32 1, %s1021_s25   ;;  %s749_s18 = sshll.u32 %s1101_s28, 7 }
  0x53   : > { %s1318_s16 = smov (!%p304_p12, %s718_s16), 3  ;;  %776 = vmatpush3.bf16.msra.mxu0 %v328_v4  ;;  %782 = vmatpush3.bf16.msra.mxu1 %v887_v6  ;;  %v891_v10 = vld [vmem:[#allocation2 + $0x20] sm:$0xff]   ;;  %v893_v12 = vld [vmem:[#allocation2 + $0x30] sm:$0xff]   ;;  %v894_v13 = vld [vmem:[#allocation2 + $0x38] sm:$0xff]   ;;  %s717_s15 = sshll.u32 %s300_s9, 3 }
  0x54   : > { %s719_s13 = sshll.u32 %s1318_s16, 3  ;;  %801 = vmatprep.subr.bf16.mxu0 %v1035_v0  ;;  %783 = vmatprep.subr.bf16.mxu1 %v1035_v0  ;;  %v895_v14 = vld [vmem:[#allocation5] sm:$0xff]   ;;  %v896_v15 = vld [vmem:[#allocation5 + $0x8] sm:$0xff]   ;;  %v897_v16 = vld [vmem:[#allocation5 + $0x10] sm:$0xff]   ;;  %s302_s16 = scalar_lea.vmem [#allocation7], %s717_s15 }
  0x55   : > { %s307_s17 = scalar_lea.vmem %s1289_s0, %s719_s13  ;;  %v898_v17 = vld [vmem:[#allocation5 + $0x18] sm:$0xff]   ;;  %v899_v18 = vld [vmem:[#allocation5 + $0x20] sm:$0xff]   ;;  %v900_v19 = vld [vmem:[#allocation5 + $0x28] sm:$0xff]   ;;  %s625_s13 = sshll.u32 %s302_s16, 4  ;;  %s1241_s13 = int_to_ptr.vmem [resolvable:$true] %s625_s13 }
  0x56   : > { %v311_v2 = vld [vmem:[%s307_s17] sm:$0xff]  ;;  %v312_v3 = vld [vmem:[%s307_s17 + $0x8] sm:$0xff]  ;;  %v901_v30 = vld [vmem:[#allocation5 + $0x30] sm:$0xff]   ;;  %s1246_s20 = scalar_lea.hbm %s1296_s7, %s749_s18  ;;  %s1248_s21 = scalar_lea.sflag [#allocation4], %s300_s9 }
  0x57   : > { %v313_v5 = vpack.c.bf16 %v312_v3, %v311_v2  ;;  %784 = vmatpush3.bf16.msra.mxu1 %v888_v7  ;;  %v720_v20 = vld [vmem:[%s1291_s2] ss:$0 sm:$0xff]  ;;  %v902_v31 = vld [vmem:[#allocation5 + $0x38] sm:$0xff]   ;;  %s959_s22 = scalar_lea.vmem %s1241_s13, 128  ;;  %p1310_p1 = scmp.ne.s32.totalorder %s1301_s11, 0 }
  0x58   : > { %785 = vmatprep.subr.bf16.mxu1 %v1035_v0  ;;  %v722_v32 = vld [vmem:[%s1293_s4] ss:$0 sm:$0xff]  ;;  %p960_p10 = scmp.ne.s32.totalorder %s1241_s13, %s959_s22  ;;  %s1037_s28 = smov [#allocation7]  }
  0x59   : > { %778 = vmatmul.mubr.msk.bf16.vlgmr.msra.gmra.mrb[0].mxu0 %vm322_vm2, %v313_v5  ;;  %v731_v42 = vld [vmem:[%s1295_s6] ss:$0 sm:$0xff]  ;;  %s963_s23 = sshll.u32 %s1037_s28, 4  ;;  %s964_s23 = int_to_ptr.vmem [resolvable:$false] %s963_s23 }
  0x5a   : > { %817 = vmatprep.mubr.msk.bf16.mxu0 %vm1036_vm0, %v1035_v0  ;;  %802 = vmatpush3.bf16.msra.mxu0 %v895_v14  ;;  %p961_p2 = pnand %p960_p10, %p1310_p1  ;;  %s965_s29 = scalar_lea.vmem %s964_s23, 256 }
  0x5b   : > { %786 = vmatpush3.bf16.msra.mxu1 %v889_v8  ;;  %803 = vmatprep.subr.bf16.mxu0 %v1035_v0  ;;  %p966_p4 = scmp.lt.s32.totalorder %s1241_s13, %s964_s23  ;;  %p967_p7 = scmp.lt.s32.totalorder %s965_s29, %s959_s22 }
  0x5c   : > { %787 = vmatprep.subr.bf16.mxu1 %v1035_v0  ;;  %p962_p3 = pneg %p961_p2 }
  0x5d   : > { %p968_p8 = por %p967_p7, %p966_p4 }
  0x5e   : > { %804 = vmatpush3.bf16.msra.mxu0 %v896_v15 }
  0x5f   : > { %788 = vmatpush3.bf16.msra.mxu1 %v890_v9  ;;  %805 = vmatprep.subr.bf16.mxu0 %v1035_v0  ;;  %p969_p11 = pnand %p968_p8, %p962_p3 }
  0x60   : > { %789 = vmatprep.subr.bf16.mxu1 %v1035_v0 }
  0x62   : > { %806 = vmatpush3.bf16.msra.mxu0 %v897_v16 }
  0x63   : > { %790 = vmatpush3.bf16.msra.mxu1 %v891_v10  ;;  %807 = vmatprep.subr.bf16.mxu0 %v1035_v0 }
  0x64   : > { %791 = vmatprep.subr.bf16.mxu1 %v1035_v0 }
  0x66   : > { %808 = vmatpush3.bf16.msra.mxu0 %v898_v17 }
  0x67   : > { %792 = vmatpush3.bf16.msra.mxu1 %v892_v11  ;;  %809 = vmatprep.subr.bf16.mxu0 %v1035_v0 }
  0x68   : > { %793 = vmatprep.subr.bf16.mxu1 %v1035_v0 }
  0x6a   : > { %810 = vmatpush3.bf16.msra.mxu0 %v899_v18 }
  0x6b   : > { %794 = vmatpush3.bf16.msra.mxu1 %v893_v12  ;;  %811 = vmatprep.subr.bf16.mxu0 %v1035_v0 }
  0x6c   : > { %795 = vmatprep.subr.bf16.mxu1 %v1035_v0 }
  0x6e   : > { %812 = vmatpush3.bf16.msra.mxu0 %v900_v19 }
  0x6f   : > { %796 = vmatpush3.bf16.msra.mxu1 %v894_v13  ;;  %813 = vmatprep.subr.bf16.mxu0 %v1035_v0 }
  0x72   : > { %814 = vmatpush3.bf16.msra.mxu0 %v901_v30 }
  0x73   : > { %815 = vmatprep.subr.bf16.mxu0 %v1035_v0 }
  0x76   : > { %816 = vmatpush3.bf16.msra.mxu0 %v902_v31 }
 0x12c   : > { %v364_v21 = vpop.f32.mrb[0].mxu0 }
 0x12d   : > { %v365_v22 = vadd.f32 %v720_v20, %v364_v21  ;;  %v779_v23 = vpop.f32.mrb[1].mxu0 }
 0x12e   : > { %v367_v24 = vpop.f32.mrb[2].mxu0 }
 0x12f   : > { %v368_v25 = vadd.f32 %v720_v20, %v367_v24  ;;  %v780_v26 = vpop.f32.mrb[3].mxu0  ;;  %v371_v27 = vmax.f32 %v365_v22, 0.0 }
 0x131   : > { %v372_v28 = vmax.f32 %v368_v25, 0.0 }
 0x133   : > { %v373_v29 = vpack.c.bf16 %v372_v28, %v371_v27 }
 0x135   : > { %798 = vmatmul.mubr.bf16.vlgmr.msra.gmra.mrb[0].mxu1 %v373_v29 }
 0x208   : > { %v479_v33 = vpop.f32.mrb[0].mxu1 }
 0x209   : > { %v480_v34 = vadd.f32 %v722_v32, %v479_v33  ;;  %v799_v35 = vpop.f32.mrb[1].mxu1 }
 0x20a   : > { %v482_v36 = vpop.f32.mrb[2].mxu1 }
 0x20b   : > { %v483_v37 = vadd.f32 %v722_v32, %v482_v36  ;;  %v800_v38 = vpop.f32.mrb[3].mxu1  ;;  %v486_v39 = vmax.f32 %v480_v34, 0.0 }
 0x20d   : > { %v487_v40 = vmax.f32 %v483_v37, 0.0 }
 0x20f   : > { %v488_v41 = vpack.c.bf16 %v487_v40, %v486_v39 }
 0x211   : > { %818 = vmatmul.mubr.bf16.vlgmr.msra.gmra.mrb[4].mxu0 %v488_v41 }
 0x2e4   : > { %v594_v43 = vpop.f32.mrb[4].mxu0 }
 0x2e5   : > { %v819_v44 = vpop.f32.mrb[5].mxu0  ;;  %v595_v46 = vadd.f32 %v731_v42, %v594_v43 }
 0x2e6   : > { %v597_v45 = vpop.f32.mrb[6].mxu0 }
 0x2e7   : > { %v598_v47 = vadd.f32 %v731_v42, %v597_v45  ;;  %v820_v48 = vpop.f32.mrb[7].mxu0 }
 0x2e9   : > { %v753_v49 = vpack.c.bf16 %v598_v47, %v595_v46 }
 0x2eb   : > { %754 = vst [vmem:[%s302_s16] sm:$0xff] %v753_v49  }
 0x2ec   : > { %972 = shalt.err (!%p969_p11)
}
 0x2ed   : > { %s973_s8 = scalar_lea.hbm %s1246_s20, 128  ;;  %s977_s10 = scalar_lea.hbm %s1296_s7, 256 }
 0x2ee   : > { %p974_p13 = scmp.ne.s32.totalorder %s1246_s20, %s973_s8  ;;  %p978_p6 = scmp.lt.u32.totalorder %s1246_s20, %s1296_s7 }
 0x2ef   : > { %p979_p9 = scmp.lt.u32.totalorder %s977_s10, %s973_s8  ;;  %p981_p10 = scmp.lt.u32.totalorder %s973_s8, %s1246_s20 }
 0x2f0   : > { %p975_p5 = pnand %p974_p13, %p1310_p1 }
 0x2f1   : > { %p980_p12 = por %p979_p9, %p978_p6 }
 0x2f2   : > { %p976_p0 = pneg %p975_p5 }
 0x2f3   : > { %p982_p2 = por %p981_p10, %p980_p12 }
 0x2f5   : > { %p983_p3 = pnand %p982_p2, %p976_p0 }
 0x2f7   : > { %986 = shalt.err (!%p983_p3)
}
 0x2f8   : > { %s1038_s18 = smov 64   ;;  %s1039_s14 = smov 4  }
 0x2f9   : > { %829 = dma.vmem_to_hbm [thread:$0]  (%p1310_p1), %s1241_s13, 128, %s1246_s20, %s1248_s21, %s1038_s18, %s1038_s18, %s1039_s14  }
 0x2fa PF: > { %p846_p4 = scmp.ge.s32.totalorder %s1029_s27, 2  ;;  %s640_s17 = sand.u32 1, %s1017_s24  }
 0x2fb   : > { %p1311_p7 = scmp.ne.s32.totalorder %s1302_s12, 0  ;;  %s641_s22 = scalar_lea.sflag [#allocation4], %s640_s17 }
 0x2fd   : > { %p839_p8 = pnand %p846_p4, %p1311_p7 }
 0x2ff   : > { %1012 = dma.done.wait (!%p839_p8), %s641_s22, 128  }
 0x300   : > { %1014 = vsyncadd (!%p839_p8), %s641_s22, 4294967168  ;;  %s1312_s28 = sld [smem:[#allocation11_spill]]  ;;  %p19_p11 = scmp.ge.s32.totalorder %s1105_s30, 4  }
 0x301   : > { %s1313_s24 = smov %s1021_s25  ;;  %s1314_s25 = smov %s1025_s26 }
 0x302   : > { %s1316_s27 = smov %s1105_s30  ;;  %21 = sbr.rel (!%p19_p11) target bundleno = 5 (0x5), region = 92 }
 0x306   : > { %s1315_s26 = smov %s1312_s28 }
 0x309   :  { %646 = vsyncpa [#allocation3], 1 }
 0x30a   :  { %648 = vsyncpa [#allocation3 + $0x1], 1 }
 0x30b   :  { %649 = vsyncpa [#allocation6], 1 }
 0x30c   :  { %650 = vsyncpa [#allocation4], 1 }
 0x30d   :  { %652 = vsyncpa [#allocation4 + $0x1], 1 }

</bundles_post_ra>
